<compile_context>
chip_gen: v5e
topology: v5e:2x2
jax: 0.10.0
libtpu: 0.0.40
codegen_flags: <defaults>
</compile_context>

<pallas_src>
import jax
import jax.numpy as jnp
from jax.experimental import pallas as pl
from jax.experimental.pallas import tpu as pltpu


def rnn_forward_kernel(x_ref, wih_ref, whh_ref, bih_ref, bhh_ref,
                       w1_ref, b1_ref, w2_ref, b2_ref, out_ref):
    S = x_ref.shape[0]
    H = whh_ref.shape[0]

    whh = whh_ref[...]                       # (H, H)  == W_hh^T
    b_rnn = bih_ref[...] + bhh_ref[...]      # (1, H)

    # Hoisted input projection: single (S, I) @ (I, H) MXU op, off the serial chain.
    xproj = (jnp.dot(x_ref[...], wih_ref[...], preferred_element_type=jnp.float32)
             + b_rnn)                        # (S, H)

    # Fully unrolled recurrence; h_t rows stay in vregs (no scratch stores).
    h = jnp.zeros((1, H), jnp.float32)       # torch.zeros(1, 1, hidden_size)
    hs = []
    for t in range(S):                       # S is static -> trace-time unroll
        pre = xproj[t:t + 1, :] + jnp.dot(h, whh, preferred_element_type=jnp.float32)
        h = jnp.maximum(pre, 0.0)            # nonlinearity='relu'
        hs.append(h)
    rnn_out = jnp.concatenate(hs, axis=0)    # (S, H)

    # Dense tail.
    d1 = jnp.dot(rnn_out, w1_ref[...], preferred_element_type=jnp.float32) + b1_ref[...]
    d1 = jnp.maximum(d1, 0.0)
    d2 = jnp.dot(d1, w2_ref[...], preferred_element_type=jnp.float32) + b2_ref[...]

    # Softmax over the last axis; reciprocal goes to the EUP slot.
    m = jnp.max(d2, axis=-1, keepdims=True)
    e = jnp.exp(d2 - m)
    denom = jnp.sum(e, axis=-1, keepdims=True)
    out_ref[...] = e * pl.reciprocal(denom, approx=True)


def rnn_forward(embedding, params):
    """embedding: (1, S, I) float32.  Returns softmax predictions (1, S, O)."""
    wih_t, whh_t, bih, bhh, w1_t, b1, w2_t, b2 = params
    B, S, I = embedding.shape
    assert B == 1, "torch forward hard-codes h0 for batch=1"
    O = w2_t.shape[1]

    x2d = embedding.reshape(S, I)
    vmem = pl.BlockSpec(memory_space=pltpu.MemorySpace.VMEM)

    out2d = pl.pallas_call(
        rnn_forward_kernel,
        out_shape=jax.ShapeDtypeStruct((S, O), jnp.float32),
        in_specs=[vmem] * 9,
        out_specs=vmem,
    )(x2d, wih_t, whh_t, bih, bhh, w1_t, b1, w2_t, b2)

    return out2d.reshape(B, S, O)


def rnn_forward_ref(embedding, params):
    """Pure-JAX reference for verification."""
    wih_t, whh_t, bih, bhh, w1_t, b1, w2_t, b2 = params
    B, S, I = embedding.shape
    H = whh_t.shape[0]
    h = jnp.zeros((B, H), jnp.float32)
    outs = []
    for t in range(S):
        h = jax.nn.relu(embedding[:, t, :] @ wih_t + bih + h @ whh_t + bhh)
        outs.append(h)
    rnn_out = jnp.stack(outs, axis=1)
    d1 = jax.nn.relu(rnn_out @ w1_t + b1)
    d2 = d1 @ w2_t + b2
    return jax.nn.softmax(d2, axis=-1)


if __name__ == "__main__":
    # Small shapes consistent with the module.
    input_size, hidden_size, dense_size, output_size = 16, 32, 32, 2
    batch, seq = 1, 8

    key = jax.random.PRNGKey(0)
    ks = jax.random.split(key, 9)

    # Deterministic init mimicking PyTorch defaults: U(-1/sqrt(fan), 1/sqrt(fan)).
    kr = 1.0 / jnp.sqrt(hidden_size)
    wih_t = jax.random.uniform(ks[0], (input_size, hidden_size), jnp.float32, -kr, kr)
    whh_t = jax.random.uniform(ks[1], (hidden_size, hidden_size), jnp.float32, -kr, kr)
    bih = jax.random.uniform(ks[2], (1, hidden_size), jnp.float32, -kr, kr)
    bhh = jax.random.uniform(ks[3], (1, hidden_size), jnp.float32, -kr, kr)

    k1 = 1.0 / jnp.sqrt(hidden_size)
    w1_t = jax.random.uniform(ks[4], (hidden_size, dense_size), jnp.float32, -k1, k1)
    b1 = jax.random.uniform(ks[5], (1, dense_size), jnp.float32, -k1, k1)

    k2 = 1.0 / jnp.sqrt(dense_size)
    w2_t = jax.random.uniform(ks[6], (dense_size, output_size), jnp.float32, -k2, k2)
    b2 = jax.random.uniform(ks[7], (1, output_size), jnp.float32, -k2, k2)

    embedding = jax.random.normal(ks[8], (batch, seq, input_size), jnp.float32)
    params = (wih_t, whh_t, bih, bhh, w1_t, b1, w2_t, b2)

    out = rnn_forward(embedding, params)
    out = jax.block_until_ready(out)

    ref = rnn_forward_ref(embedding, params)
    assert out.shape == (batch, seq, output_size)
    # Tolerance slightly relaxed for the EUP approximate reciprocal in the softmax.
    assert bool(jnp.allclose(out, ref, atol=5e-3, rtol=5e-3)), "mismatch vs pure-JAX reference"

    print("KERNEL_OK")
</pallas_src>

<mosaic_0001>
module attributes {stable_mosaic.version = 11 : i64} {
  func.func @rnn_forward_kernel(%arg0: memref<8x16xf32, #tpu.memory_space<vmem>>, %arg1: memref<16x32xf32, #tpu.memory_space<vmem>>, %arg2: memref<32x32xf32, #tpu.memory_space<vmem>>, %arg3: memref<1x32xf32, #tpu.memory_space<vmem>>, %arg4: memref<1x32xf32, #tpu.memory_space<vmem>>, %arg5: memref<32x32xf32, #tpu.memory_space<vmem>>, %arg6: memref<1x32xf32, #tpu.memory_space<vmem>>, %arg7: memref<32x2xf32, #tpu.memory_space<vmem>>, %arg8: memref<1x2xf32, #tpu.memory_space<vmem>>, %arg9: memref<8x2xf32, #tpu.memory_space<vmem>>) attributes {dimension_semantics = [], scalar_prefetch = 0 : i64, scratch_operands = 0 : i64, tpu.core_type = #tpu.core_type<tc>} {
    %c0 = arith.constant 0 : index
    %c0_0 = arith.constant 0 : index
    %0 = vector.load %arg2[%c0, %c0_0] : memref<32x32xf32, #tpu.memory_space<vmem>>, vector<32x32xf32>
    %c0_1 = arith.constant 0 : index
    %c0_2 = arith.constant 0 : index
    %1 = vector.load %arg3[%c0_1, %c0_2] : memref<1x32xf32, #tpu.memory_space<vmem>>, vector<1x32xf32>
    %c0_3 = arith.constant 0 : index
    %c0_4 = arith.constant 0 : index
    %2 = vector.load %arg4[%c0_3, %c0_4] : memref<1x32xf32, #tpu.memory_space<vmem>>, vector<1x32xf32>
    %3 = arith.addf %1, %2 : vector<1x32xf32>
    %c0_5 = arith.constant 0 : index
    %c0_6 = arith.constant 0 : index
    %4 = vector.load %arg0[%c0_5, %c0_6] : memref<8x16xf32, #tpu.memory_space<vmem>>, vector<8x16xf32>
    %c0_7 = arith.constant 0 : index
    %c0_8 = arith.constant 0 : index
    %5 = vector.load %arg1[%c0_7, %c0_8] : memref<16x32xf32, #tpu.memory_space<vmem>>, vector<16x32xf32>
    %cst = arith.constant dense<0.000000e+00> : vector<8x32xf32>
    %6 = tpu.matmul %4, %5, %cst {dimension_numbers = #tpu.dot_dimension_numbers<[1], [0], [0], [1], [0, 0, 1, 1], [], []>} : vector<8x16xf32>, vector<16x32xf32>, vector<8x32xf32> -> vector<8x32xf32>
    %7 = vector.broadcast %3 : vector<1x32xf32> to vector<8x32xf32>
    %8 = arith.addf %6, %7 : vector<8x32xf32>
    %cst_9 = arith.constant 0.000000e+00 : f32
    %9 = vector.broadcast %cst_9 : f32 to vector<1x32xf32>
    %10 = vector.extract_strided_slice %8 {offsets = [0, 0], sizes = [1, 32], strides = [1, 1]} : vector<8x32xf32> to vector<1x32xf32>
    %cst_10 = arith.constant dense<0.000000e+00> : vector<1x32xf32>
    %11 = tpu.matmul %9, %0, %cst_10 {dimension_numbers = #tpu.dot_dimension_numbers<[1], [0], [0], [1], [0, 0, 1, 1], [], []>} : vector<1x32xf32>, vector<32x32xf32>, vector<1x32xf32> -> vector<1x32xf32>
    %12 = arith.addf %10, %11 : vector<1x32xf32>
    %cst_11 = arith.constant 0.000000e+00 : f32
    %13 = vector.broadcast %cst_11 : f32 to vector<1x32xf32>
    %14 = arith.maximumf %12, %13 : vector<1x32xf32>
    %15 = vector.extract_strided_slice %8 {offsets = [1, 0], sizes = [1, 32], strides = [1, 1]} : vector<8x32xf32> to vector<1x32xf32>
    %cst_12 = arith.constant dense<0.000000e+00> : vector<1x32xf32>
    %16 = tpu.matmul %14, %0, %cst_12 {dimension_numbers = #tpu.dot_dimension_numbers<[1], [0], [0], [1], [0, 0, 1, 1], [], []>} : vector<1x32xf32>, vector<32x32xf32>, vector<1x32xf32> -> vector<1x32xf32>
    %17 = arith.addf %15, %16 : vector<1x32xf32>
    %cst_13 = arith.constant 0.000000e+00 : f32
    %18 = vector.broadcast %cst_13 : f32 to vector<1x32xf32>
    %19 = arith.maximumf %17, %18 : vector<1x32xf32>
    %20 = vector.extract_strided_slice %8 {offsets = [2, 0], sizes = [1, 32], strides = [1, 1]} : vector<8x32xf32> to vector<1x32xf32>
    %cst_14 = arith.constant dense<0.000000e+00> : vector<1x32xf32>
    %21 = tpu.matmul %19, %0, %cst_14 {dimension_numbers = #tpu.dot_dimension_numbers<[1], [0], [0], [1], [0, 0, 1, 1], [], []>} : vector<1x32xf32>, vector<32x32xf32>, vector<1x32xf32> -> vector<1x32xf32>
    %22 = arith.addf %20, %21 : vector<1x32xf32>
    %cst_15 = arith.constant 0.000000e+00 : f32
    %23 = vector.broadcast %cst_15 : f32 to vector<1x32xf32>
    %24 = arith.maximumf %22, %23 : vector<1x32xf32>
    %25 = vector.extract_strided_slice %8 {offsets = [3, 0], sizes = [1, 32], strides = [1, 1]} : vector<8x32xf32> to vector<1x32xf32>
    %cst_16 = arith.constant dense<0.000000e+00> : vector<1x32xf32>
    %26 = tpu.matmul %24, %0, %cst_16 {dimension_numbers = #tpu.dot_dimension_numbers<[1], [0], [0], [1], [0, 0, 1, 1], [], []>} : vector<1x32xf32>, vector<32x32xf32>, vector<1x32xf32> -> vector<1x32xf32>
    %27 = arith.addf %25, %26 : vector<1x32xf32>
    %cst_17 = arith.constant 0.000000e+00 : f32
    %28 = vector.broadcast %cst_17 : f32 to vector<1x32xf32>
    %29 = arith.maximumf %27, %28 : vector<1x32xf32>
    %30 = vector.extract_strided_slice %8 {offsets = [4, 0], sizes = [1, 32], strides = [1, 1]} : vector<8x32xf32> to vector<1x32xf32>
    %cst_18 = arith.constant dense<0.000000e+00> : vector<1x32xf32>
    %31 = tpu.matmul %29, %0, %cst_18 {dimension_numbers = #tpu.dot_dimension_numbers<[1], [0], [0], [1], [0, 0, 1, 1], [], []>} : vector<1x32xf32>, vector<32x32xf32>, vector<1x32xf32> -> vector<1x32xf32>
    %32 = arith.addf %30, %31 : vector<1x32xf32>
    %cst_19 = arith.constant 0.000000e+00 : f32
    %33 = vector.broadcast %cst_19 : f32 to vector<1x32xf32>
    %34 = arith.maximumf %32, %33 : vector<1x32xf32>
    %35 = vector.extract_strided_slice %8 {offsets = [5, 0], sizes = [1, 32], strides = [1, 1]} : vector<8x32xf32> to vector<1x32xf32>
    %cst_20 = arith.constant dense<0.000000e+00> : vector<1x32xf32>
    %36 = tpu.matmul %34, %0, %cst_20 {dimension_numbers = #tpu.dot_dimension_numbers<[1], [0], [0], [1], [0, 0, 1, 1], [], []>} : vector<1x32xf32>, vector<32x32xf32>, vector<1x32xf32> -> vector<1x32xf32>
    %37 = arith.addf %35, %36 : vector<1x32xf32>
    %cst_21 = arith.constant 0.000000e+00 : f32
    %38 = vector.broadcast %cst_21 : f32 to vector<1x32xf32>
    %39 = arith.maximumf %37, %38 : vector<1x32xf32>
    %40 = vector.extract_strided_slice %8 {offsets = [6, 0], sizes = [1, 32], strides = [1, 1]} : vector<8x32xf32> to vector<1x32xf32>
    %cst_22 = arith.constant dense<0.000000e+00> : vector<1x32xf32>
    %41 = tpu.matmul %39, %0, %cst_22 {dimension_numbers = #tpu.dot_dimension_numbers<[1], [0], [0], [1], [0, 0, 1, 1], [], []>} : vector<1x32xf32>, vector<32x32xf32>, vector<1x32xf32> -> vector<1x32xf32>
    %42 = arith.addf %40, %41 : vector<1x32xf32>
    %cst_23 = arith.constant 0.000000e+00 : f32
    %43 = vector.broadcast %cst_23 : f32 to vector<1x32xf32>
    %44 = arith.maximumf %42, %43 : vector<1x32xf32>
    %45 = vector.extract_strided_slice %8 {offsets = [7, 0], sizes = [1, 32], strides = [1, 1]} : vector<8x32xf32> to vector<1x32xf32>
    %cst_24 = arith.constant dense<0.000000e+00> : vector<1x32xf32>
    %46 = tpu.matmul %44, %0, %cst_24 {dimension_numbers = #tpu.dot_dimension_numbers<[1], [0], [0], [1], [0, 0, 1, 1], [], []>} : vector<1x32xf32>, vector<32x32xf32>, vector<1x32xf32> -> vector<1x32xf32>
    %47 = arith.addf %45, %46 : vector<1x32xf32>
    %cst_25 = arith.constant 0.000000e+00 : f32
    %48 = vector.broadcast %cst_25 : f32 to vector<1x32xf32>
    %49 = arith.maximumf %47, %48 : vector<1x32xf32>
    %50 = tpu.concatenate %14, %19, %24, %29, %34, %39, %44, %49 in 0 : vector<1x32xf32>, vector<1x32xf32>, vector<1x32xf32>, vector<1x32xf32>, vector<1x32xf32>, vector<1x32xf32>, vector<1x32xf32>, vector<1x32xf32> -> vector<8x32xf32>
    %c0_26 = arith.constant 0 : index
    %c0_27 = arith.constant 0 : index
    %51 = vector.load %arg5[%c0_26, %c0_27] : memref<32x32xf32, #tpu.memory_space<vmem>>, vector<32x32xf32>
    %cst_28 = arith.constant dense<0.000000e+00> : vector<8x32xf32>
    %52 = tpu.matmul %50, %51, %cst_28 {dimension_numbers = #tpu.dot_dimension_numbers<[1], [0], [0], [1], [0, 0, 1, 1], [], []>} : vector<8x32xf32>, vector<32x32xf32>, vector<8x32xf32> -> vector<8x32xf32>
    %c0_29 = arith.constant 0 : index
    %c0_30 = arith.constant 0 : index
    %53 = vector.load %arg6[%c0_29, %c0_30] : memref<1x32xf32, #tpu.memory_space<vmem>>, vector<1x32xf32>
    %54 = vector.broadcast %53 : vector<1x32xf32> to vector<8x32xf32>
    %55 = arith.addf %52, %54 : vector<8x32xf32>
    %cst_31 = arith.constant 0.000000e+00 : f32
    %56 = vector.broadcast %cst_31 : f32 to vector<8x32xf32>
    %57 = arith.maximumf %55, %56 : vector<8x32xf32>
    %c0_32 = arith.constant 0 : index
    %c0_33 = arith.constant 0 : index
    %58 = vector.load %arg7[%c0_32, %c0_33] : memref<32x2xf32, #tpu.memory_space<vmem>>, vector<32x2xf32>
    %cst_34 = arith.constant dense<0.000000e+00> : vector<8x2xf32>
    %59 = tpu.matmul %57, %58, %cst_34 {dimension_numbers = #tpu.dot_dimension_numbers<[1], [0], [0], [1], [0, 0, 1, 1], [], []>} : vector<8x32xf32>, vector<32x2xf32>, vector<8x2xf32> -> vector<8x2xf32>
    %c0_35 = arith.constant 0 : index
    %c0_36 = arith.constant 0 : index
    %60 = vector.load %arg8[%c0_35, %c0_36] : memref<1x2xf32, #tpu.memory_space<vmem>>, vector<1x2xf32>
    %61 = vector.broadcast %60 : vector<1x2xf32> to vector<8x2xf32>
    %62 = arith.addf %59, %61 : vector<8x2xf32>
    %cst_37 = arith.constant dense<0xFF800000> : vector<8xf32>
    %63 = vector.multi_reduction <maximumf>, %62, %cst_37 [1] : vector<8x2xf32> to vector<8xf32>
    %64 = vector.shape_cast %63 : vector<8xf32> to vector<8x1xf32>
    %65 = vector.broadcast %64 : vector<8x1xf32> to vector<8x2xf32>
    %66 = arith.subf %62, %65 : vector<8x2xf32>
    %67 = math.exp %66 : vector<8x2xf32>
    %cst_38 = arith.constant dense<0.000000e+00> : vector<8xf32>
    %68 = vector.multi_reduction <add>, %67, %cst_38 [1] : vector<8x2xf32> to vector<8xf32>
    %69 = vector.shape_cast %68 : vector<8xf32> to vector<8x1xf32>
    %70 = tpu.reciprocal %69 {approx = true} : vector<8x1xf32> -> vector<8x1xf32>
    %71 = vector.broadcast %70 : vector<8x1xf32> to vector<8x2xf32>
    %72 = arith.mulf %67, %71 : vector<8x2xf32>
    %c0_39 = arith.constant 0 : index
    %c0_40 = arith.constant 0 : index
    %73 = vector.load %arg9[%c0_39, %c0_40] : memref<8x2xf32, #tpu.memory_space<vmem>>, vector<8x2xf32>
    tpu.vector_store %arg9[%c0_39, %c0_40], %72 {strides = array<i32>} : memref<8x2xf32, #tpu.memory_space<vmem>>, vector<8x2xf32>,
    return
  }
}

</mosaic_0001>

<bundles_post_ra>
// kernel: tpu_custom_call.1
= control target key start
LH: loop header
LB: loop body
LE: loop exit
PB: predicated region body
PF: predicated region fallthrough
CT: control target
= control target key end

     0   :  { %14 = vsyncpa [#allocation3], 0  ;;  %s659_s0 = inlined_call_operand.hbm [shape: f32[8,16], index: 0, kind: input, shape index: {}]   ;;  %s660_s1 = inlined_call_operand.hbm [shape: f32[16,32], index: 1, kind: input, shape index: {}]   ;;  %s661_s2 = inlined_call_operand.vmem [shape: f32[32,32], index: 2, kind: input, shape index: {}]   ;;  %s662_s3 = inlined_call_operand.vmem [shape: f32[1,32], index: 3, kind: input, shape index: {}]   ;;  %s663_s4 = inlined_call_operand.vmem [shape: f32[1,32], index: 4, kind: input, shape index: {}]   ;;  %s664_s5 = inlined_call_operand.hbm [shape: f32[32,32], index: 5, kind: input, shape index: {}]   ;;  %s665_s6 = inlined_call_operand.vmem [shape: f32[1,32], index: 6, kind: input, shape index: {}]   ;;  %s666_s7 = inlined_call_operand.vmem [shape: f32[32,2], index: 7, kind: input, shape index: {}]   ;;  %s667_s8 = inlined_call_operand.vmem [shape: f32[1,2], index: 8, kind: input, shape index: {}]   ;;  %s668_s9 = inlined_call_operand.vmem [shape: f32[8,2], index: 9, kind: output, shape index: {}]  }
   0x1   :  { %15 = vsyncpa [#allocation5], 0  ;;  %s31_s11 = sshll.u32 %s660_s1, 4  ;;  %s536_s12 = smov [#allocation4]   ;;  %s32_s11 = int_to_ptr.hbm [resolvable:$true] %s31_s11 }
   0x2   :  { %s33_s13 = sshll.u32 %s536_s12, 4  ;;  %s21_s16 = sshll.u32 %s659_s0, 4  ;;  %s34_s13 = int_to_ptr.vmem [resolvable:$true] %s33_s13  ;;  %s22_s16 = int_to_ptr.hbm [resolvable:$true] %s21_s16 }
   0x3   :  { %s537_s17 = smov 128   ;;  %s538_s18 = smov 8  }
   0x4   :  { %39 = dma.hbm_to_vmem [thread:$0]  %s32_s11, 256, %s34_s13, [#allocation5], %s537_s17, %s537_s17, %s538_s18  }
   0x5   :  { %s539_s19 = smov [#allocation2]   ;;  %s50_s23 = sshll.u32 %s664_s5, 4  ;;  %s51_s23 = int_to_ptr.hbm [resolvable:$true] %s50_s23 }
   0x6   :  { %s23_s20 = sshll.u32 %s539_s19, 4  ;;  %s540_s1 = smov [#allocation6]   ;;  %s24_s20 = int_to_ptr.vmem [resolvable:$true] %s23_s20 }
   0x7   :  { %26 = dma.hbm_to_vmem [thread:$0]  %s22_s16, 128, %s24_s20, [#allocation3]  }
   0x8   :  { %s52_s24 = sshll.u32 %s540_s1, 4  ;;  %s53_s24 = int_to_ptr.vmem [resolvable:$true] %s52_s24 }
   0x9   :  { %58 = dma.hbm_to_vmem [thread:$0]  %s51_s23, 512, %s53_s24, [#allocation5], %s537_s17, %s537_s17, %s538_s18  }
   0xa   :  { %532 = dma.done.wait [#allocation3], 128  }
   0xb   :  { %533 = vsyncadd [#allocation3], 4294967168 }
   0xc   :  { %534 = dma.done.wait [#allocation5], 768  }
   0xd   :  { %535 = vsyncadd [#allocation5], 4294966528  ;;  %v80_v0 = vld [vmem:[%s661_s2 + $0x18] sm:$0xff]  ;;  %v86_v1 = vld [vmem:[#allocation4 + $0x8] sm:$0xff]  ;;  %vm90_vm0 = vcmask 130048   ;;  %v541_v7 = vmov 0.0  }
   0xe   :  { %v79_v2 = vld [vmem:[%s661_s2 + $0x10] sm:$0xff]  ;;  %130 = vmatpush.msra.mxu1 %v80_v0  ;;  %108 = vmatpush.msra.mxu0 %v86_v1  ;;  %v85_v3 = vld [vmem:[#allocation4] sm:$0xff]  ;;  %v84_v4 = vld [vmem:[#allocation2] sm:$0xff]  ;;  %vm114_vm1 = vcmask 261120   ;;  %vm342_vm2 = vcmask 1040384   ;;  %vm344_vm3 = vcmask 1041408  }
   0xf   :  { %v78_v5 = vld [vmem:[%s661_s2 + $0x8] sm:$0xff]  ;;  %155 = vmatpush.msra.mxu2 %v80_v0  ;;  %184 = vmatpush.msra.mxu3 %v80_v0  ;;  %v77_v6 = vld [vmem:[%s661_s2] sm:$0xff]  ;;  %vm346_vm4 = vcmask 1042432   ;;  %vm348_vm5 = vcmask 1043456   ;;  %vm350_vm6 = vcmask 1044480   ;;  %vm352_vm7 = vcmask 1045504  }
  0x10   :  { %131 = vmatpush.msra.mxu1 %v79_v2  ;;  %109 = vmatpush.msra.mxu0 %v85_v3  ;;  %v81_v8 = vld [vmem:[%s662_s3] sm:$0x1]  ;;  %v359_v53 = vld [vmem:[#allocation6 + $0x18] sm:$0xff]  ;;  %v358_v54 = vld [vmem:[#allocation6 + $0x10] sm:$0xff]  ;;  %vm354_vm8 = vcmask 1046528   ;;  %vm419_vm9 = vcmask 15360  }
  0x11   :  { %438 = vmatmul.msk.f32.vlgmr.msra.gmra.mxu0 %vm90_vm0, %v84_v4  ;;  %156 = vmatpush.msra.mxu2 %v79_v2  ;;  %v82_v9 = vld [vmem:[%s663_s4] sm:$0x1]  ;;  %v356_v56 = vld [vmem:[#allocation6] sm:$0xff]  ;;  %v390_v58 = vld [vmem:[%s666_s7 + $0x10] sm:$0xff] }
  0x12   :  { %132 = vmatpush.msra.mxu1 %v78_v5  ;;  %185 = vmatpush.msra.mxu3 %v79_v2  ;;  %v83_v10 = vadd.f32 %v82_v9, %v81_v8  ;;  %v357_v55 = vld [vmem:[#allocation6 + $0x8] sm:$0xff]  ;;  %v391_v57 = vld [vmem:[%s666_s7 + $0x18] sm:$0xff] }
  0x13   :  { %157 = vmatpush.msra.mxu2 %v78_v5  ;;  %213 = vmatpush.msrb.mxu0 %v80_v0  ;;  %v388_v1 = vld [vmem:[%s666_s7] sm:$0xff] }
  0x14   :  { %133 = vmatpush.msra.mxu1 %v77_v6  ;;  %186 = vmatpush.msra.mxu3 %v78_v5  ;;  %v88_v11 = vperm.slane %v83_v10, 0 }
  0x15   :  { %134 = vmatmul.f32.vlgmr.msra.gmra.mxu1 %v541_v7  ;;  %158 = vmatpush.msra.mxu2 %v77_v6 }
  0x16   :  { %187 = vmatpush.msra.mxu3 %v77_v6  ;;  %214 = vmatpush.msrb.mxu0 %v79_v2 }
  0x17   :  { %242 = vmatpush.msrb.mxu1 %v80_v0  ;;  %271 = vmatpush.msrb.mxu2 %v80_v0 }
  0x18   :  { %215 = vmatpush.msrb.mxu0 %v78_v5  ;;  %300 = vmatpush.msrb.mxu3 %v80_v0 }
  0x19   :  { %243 = vmatpush.msrb.mxu1 %v79_v2  ;;  %272 = vmatpush.msrb.mxu2 %v79_v2 }
  0x1a   :  { %216 = vmatpush.msrb.mxu0 %v77_v6  ;;  %301 = vmatpush.msrb.mxu3 %v79_v2 }
  0x1b   :  { %244 = vmatpush.msrb.mxu1 %v78_v5  ;;  %273 = vmatpush.msrb.mxu2 %v78_v5 }
  0x1c   :  { %302 = vmatpush.msrb.mxu3 %v78_v5  ;;  %329 = vmatpush.msra.mxu0 %v80_v0  ;;  %v389_v0 = vld [vmem:[%s666_s7 + $0x8] sm:$0xff] }
  0x1d   :  { %245 = vmatpush.msrb.mxu1 %v77_v6  ;;  %274 = vmatpush.msrb.mxu2 %v77_v6 }
  0x1e   :  { %303 = vmatpush.msrb.mxu3 %v77_v6  ;;  %330 = vmatpush.msra.mxu0 %v79_v2  ;;  %v454_v2 = vld [vmem:[%s665_s6] ss:$0 sm:$0xff] }
  0x1f   :  { %379 = vmatpush.msra.mxu1 %v359_v53 }
  0x20   :  { %331 = vmatpush.msra.mxu0 %v78_v5 }
  0x21   :  { %380 = vmatpush.msra.mxu1 %v358_v54 }
  0x22   :  { %332 = vmatpush.msra.mxu0 %v77_v6  ;;  %v455_v6 = vld [vmem:[%s667_s8] ss:$0 sm:$0xff] }
  0x23   :  { %381 = vmatpush.msra.mxu1 %v357_v55 }
  0x25   :  { %382 = vmatpush.msra.mxu1 %v356_v56 }
  0x8e   :  { %v111_v12 = vpop.f32.mrf.mxu0 }
  0x8f   :  { %v619_v13 = vadd.f32 %v111_v12, %v88_v11 }
  0x92   :  { %v135_v14 = vpop.f32.mrf.mxu1 }
  0x93   :  { %v138_v15 = vadd.f32 %v135_v14, %v619_v13 }
  0x95   :  { %v139_v16 = vmax.f32 %v138_v15, 0.0 }
  0x97   :  { %439 = vmatmul.msk.f32.vlgmr.msra.gmra.mxu2 %vm114_vm1, %v139_v16 }
  0x98   :  { %411 = vmatpush.msra.mxu2 %v391_v57 }
  0x9a   :  { %412 = vmatpush.msra.mxu2 %v390_v58 }
  0x9c   :  { %413 = vmatpush.msra.mxu2 %v389_v0 }
  0x9e   :  { %414 = vmatpush.msra.mxu2 %v388_v1 }
 0x11a   :  { %v160_v17 = vpop.f32.mrf.mxu2 }
 0x11b   :  { %v164_v18 = vrot.slane %v160_v17, 7 }
 0x11d   :  { %v166_v19 = vadd.f32 %v164_v18, %v619_v13 }
 0x11f   :  { %v167_v20 = vmax.f32 %v166_v19, 0.0 }
 0x121   :  { %v169_v21 = vrot.slane %v167_v20, 1  ;;  %v343_v26 = vsel %vm342_vm2, %v139_v16, %v167_v20 }
 0x123   :  { %440 = vmatmul.msk.f32.vlgmr.msra.gmra.mxu3 %vm114_vm1, %v169_v21 }
 0x1a6   :  { %v189_v22 = vpop.f32.mrf.mxu3 }
 0x1a7   :  { %v193_v23 = vrot.slane %v189_v22, 6 }
 0x1a9   :  { %v195_v24 = vadd.f32 %v193_v23, %v619_v13 }
 0x1ab   :  { %v196_v25 = vmax.f32 %v195_v24, 0.0 }
 0x1ad   :  { %v198_v27 = vrot.slane %v196_v25, 2  ;;  %v345_v28 = vsel %vm344_vm3, %v343_v26, %v196_v25 }
 0x1af   :  { %441 = vmatmul.msk.f32.vlgmr.msrb.gmra.mxu0 %vm114_vm1, %v198_v27 }
 0x22c   :  { %v218_v29 = vpop.f32.mrf.mxu0 }
 0x22d   :  { %v222_v30 = vrot.slane %v218_v29, 5 }
 0x22f   :  { %v224_v31 = vadd.f32 %v222_v30, %v619_v13 }
 0x231   :  { %v225_v32 = vmax.f32 %v224_v31, 0.0 }
 0x233   :  { %v227_v33 = vrot.slane %v225_v32, 3  ;;  %v347_v34 = vsel %vm346_vm4, %v345_v28, %v225_v32 }
 0x235   :  { %442 = vmatmul.msk.f32.vlgmr.msrb.gmra.mxu1 %vm114_vm1, %v227_v33 }
 0x2b2   :  { %v247_v35 = vpop.f32.mrf.mxu1 }
 0x2b3   :  { %v251_v36 = vrot.slane %v247_v35, 4 }
 0x2b5   :  { %v253_v37 = vadd.f32 %v251_v36, %v619_v13 }
 0x2b7   :  { %v254_v38 = vmax.f32 %v253_v37, 0.0 }
 0x2b9   :  { %v256_v39 = vrot.slane %v254_v38, 4  ;;  %v349_v40 = vsel %vm348_vm5, %v347_v34, %v254_v38 }
 0x2bb   :  { %443 = vmatmul.msk.f32.vlgmr.msrb.gmra.mxu2 %vm114_vm1, %v256_v39 }
 0x33e   :  { %v276_v41 = vpop.f32.mrf.mxu2 }
 0x33f   :  { %v280_v42 = vrot.slane %v276_v41, 3 }
 0x341   :  { %v282_v43 = vadd.f32 %v280_v42, %v619_v13 }
 0x343   :  { %v283_v44 = vmax.f32 %v282_v43, 0.0 }
 0x345   :  { %v285_v45 = vrot.slane %v283_v44, 5  ;;  %v351_v46 = vsel %vm350_vm6, %v349_v40, %v283_v44 }
 0x347   :  { %444 = vmatmul.msk.f32.vlgmr.msrb.gmra.mxu3 %vm114_vm1, %v285_v45 }
 0x3ca   :  { %v305_v47 = vpop.f32.mrf.mxu3 }
 0x3cb   :  { %v309_v48 = vrot.slane %v305_v47, 2 }
 0x3cd   :  { %v311_v49 = vadd.f32 %v309_v48, %v619_v13 }
 0x3cf   :  { %v312_v50 = vmax.f32 %v311_v49, 0.0 }
 0x3d1   :  { %v314_v51 = vrot.slane %v312_v50, 6  ;;  %v353_v52 = vsel %vm352_vm7, %v351_v46, %v312_v50 }
 0x3d3   :  { %445 = vmatmul.msk.f32.vlgmr.msra.gmra.mxu0 %vm114_vm1, %v314_v51 }
 0x450   :  { %v334_v59 = vpop.f32.mrf.mxu0 }
 0x451   :  { %v338_v60 = vrot.slane %v334_v59, 1 }
 0x453   :  { %v340_v61 = vadd.f32 %v338_v60, %v619_v13 }
 0x455   :  { %v341_v62 = vmax.f32 %v340_v61, 0.0 }
 0x457   :  { %v355_v63 = vsel %vm354_vm8, %v353_v52, %v341_v62 }
 0x458   :  { %446 = vmatmul.msk.f32.vlgmr.msra.gmra.mxu1 %vm114_vm1, %v355_v63 }
 0x4d5   :  { %v384_v3 = vpop.f32.mrf.mxu1 }
 0x4d6   :  { %v385_v4 = vadd.f32 %v454_v2, %v384_v3 }
 0x4d8   :  { %v387_v5 = vmax.f32 %v385_v4, 0.0 }
 0x4da   :  { %447 = vmatmul.msk.f32.vlgmr.msra.gmra.mxu2 %vm114_vm1, %v387_v5 }
 0x55d   :  { %v416_v7 = vpop.f32.mrf.mxu2 }
 0x55e   :  { %v417_v8 = vadd.f32 %v455_v6, %v416_v7 }
 0x560   :  { %v420_v9 = vsel %vm419_vm9, %v417_v8, -inf }
 0x561   :  { %421 = vmax.xlane.f32.xlu0 %v420_v9 }
 0x5d4   :  { %v422_v10 = vpop.xlane.xlu0 %421 }
 0x5d5   :  { %v423_v11 = vsub.f32 %v417_v8, %v422_v10 }
 0x5d7   :  { %v424_v12 = vmul.f32 1.442695, %v423_v11 }
 0x5d9   :  { %456 = vpow2.f32 %v424_v12 }
 0x5df   :  { %v457_v13 = vpop.eup %456 }
 0x5e0   :  { %v426_v14 = vsel %vm419_vm9, %v457_v13, 0.0 }
 0x5e1   :  { %427 = vadd.xlane.f32.xlu0 %v426_v14 }
 0x654   :  { %v428_v15 = vpop.xlane.xlu0 %427 }
 0x655   :  { %458 = vrcp.f32 %v428_v15 }
 0x65b   :  { %v459_v16 = vpop.eup %458 }
 0x65c   :  { %v430_v17 = vmul.f32 %v459_v16, %v457_v13 }
 0x65e   :  { %431 = vst.msk [vmem:[%s668_s9] sm:$0xff] %vm419_vm9, %v430_v17 }
 0x65f   :  { %436 = vsyncpa [#allocation3], 1 }
 0x660   :  { %437 = vsyncpa [#allocation5], 1 }

</bundles_post_ra>
